<compile_context>
chip_gen: v7x
topology: tpu7x:2x2x1
jax: 0.10.0
libtpu: 0.0.40
codegen_flags: <defaults>
</compile_context>

<pallas_src>
import jax
import jax.numpy as jnp
from jax.experimental import pallas as pl
from jax.experimental.pallas import tpu as pltpu


def _normalize_kernel(x_ref, m_ref, inv_s_ref, o_ref):
    # x_ref: (TM, TN); m_ref / inv_s_ref: (TM, 1) -> broadcast over lanes.
    # Pure VPU work; the kernel is HBM-bandwidth bound on v5e/v6e/v7x.
    o_ref[...] = (x_ref[...] - m_ref[...]) * inv_s_ref[...]


def _round_up(x, m):
    return ((x + m - 1) // m) * m


def _sublane_unit(dtype):
    # Minimum second-to-last tile dim: 8 for 32-bit, 16 for 16-bit, 32 for 8-bit.
    return 8 * max(1, 4 // jnp.dtype(dtype).itemsize)


def _choose_tiles(bc, hw, dtype, tile_budget_bytes):
    """Pick (tm, tn) for the (bc, hw) slab.

    Preference order (per perf review):
      * full-row tiles (tn == hw) whenever one sublane-unit of full rows fits
        the budget -> each input/output DMA is one contiguous HBM chunk;
      * otherwise keep tn a large multiple of 128 so the ~0.35 us per-step
        pipeline overhead stays well amortized (never collapses to tn=128
        unless hw itself is tiny).
    """
    itemsize = jnp.dtype(dtype).itemsize
    unit = _sublane_unit(dtype)

    if hw * itemsize * unit <= tile_budget_bytes:
        tn = hw  # full-row tile (block dim == full array dim is always legal)
        tm = (tile_budget_bytes // (hw * itemsize)) // unit * unit
        tm = max(unit, min(tm, _round_up(bc, unit)))
        # Keep >= 2 row tiles when possible so the megacore-sharded "parallel"
        # axis has work for both v7x TensorCores.
        if bc > unit and pl.cdiv(bc, tm) < 2:
            tm = max(unit, _round_up(pl.cdiv(bc, 2), unit))
    else:
        tm = unit
        tn = (tile_budget_bytes // (tm * itemsize)) // 128 * 128
        tn = max(128, min(tn, _round_up(hw, 128)))
    return tm, tn


def normalize(x, mean_c, std_c, *, tile_budget_bytes=4 * 1024 * 1024):
    """x: (B, C, H, W); mean_c / std_c: (C,). Returns (x - mean[c]) / std[c]."""
    b, c, h, w = x.shape
    bc, hw = b * c, h * w

    # (B*C, H*W) slab; no padding -- ragged edges handled by the cdiv grid.
    x2d = x.reshape(bc, hw)

    # Per-row mean and reciprocal std columns (tiny: bc * itemsize bytes each).
    # The divide happens once on C elements here; the kernel only multiplies.
    m2d = jnp.tile(mean_c.astype(x.dtype), (b,)).reshape(bc, 1)
    inv_s2d = jnp.tile((1.0 / std_c).astype(x.dtype), (b,)).reshape(bc, 1)

    tm, tn = _choose_tiles(bc, hw, x.dtype, tile_budget_bytes)
    grid = (pl.cdiv(bc, tm), pl.cdiv(hw, tn))

    out2d = pl.pallas_call(
        _normalize_kernel,
        out_shape=jax.ShapeDtypeStruct((bc, hw), x.dtype),
        grid=grid,
        in_specs=[
            pl.BlockSpec((tm, tn), lambda i, j: (i, j)),   # x tile
            # Lane axis (j) is the innermost grid axis, so these (tm, 1)
            # blocks keep the same index across the inner loop (no re-DMA).
            pl.BlockSpec((tm, 1), lambda i, j: (i, 0)),    # mean column
            pl.BlockSpec((tm, 1), lambda i, j: (i, 0)),    # 1/std column
        ],
        out_specs=pl.BlockSpec((tm, tn), lambda i, j: (i, j)),
        compiler_params=pltpu.CompilerParams(
            dimension_semantics=("parallel", "parallel"),
            # Live set: double-buffered in + out tiles = 4 x tile budget
            # (16 MiB at the 4 MiB default) + tiny column buffers; 48 MiB is
            # safe on every generation (v7x has 64 MiB/TC, v5e/v6e 128 MiB)
            # and well above v5e's 16 MiB scoped default.
            vmem_limit_bytes=48 * 1024 * 1024,
        ),
    )(x2d, m2d, inv_s2d)

    return out2d.reshape(b, c, h, w)


if __name__ == "__main__":
    # Deterministic buffers from the module's __init__ (ImageNet stats, C=3).
    mean_c = jnp.array([0.485, 0.456, 0.406], dtype=jnp.float32)
    std_c = jnp.array([0.229, 0.224, 0.225], dtype=jnp.float32)

    # Small NCHW input consistent with the module (3 channels required).
    key = jax.random.PRNGKey(0)
    x = jax.random.uniform(key, (2, 3, 16, 16), dtype=jnp.float32)

    out = jax.block_until_ready(normalize(x, mean_c, std_c))

    # Reference check (pure JAX, mirrors the PyTorch forward exactly).
    ref = (x - mean_c.reshape(1, 3, 1, 1)) / std_c.reshape(1, 3, 1, 1)
    assert out.shape == x.shape and out.dtype == x.dtype
    # Kernel uses (x - m) * (1/s) vs reference (x - m) / s -> one extra
    # rounding step; tolerance covers it (op is mem-bound, exactness traded
    # deliberately to keep the inner loop a subtract + multiply).
    assert jnp.allclose(out, ref, atol=1e-5, rtol=1e-5)

    print("KERNEL_OK")
</pallas_src>

<mosaic_0001>
module attributes {stable_mosaic.version = 11 : i64} {
  func.func @_normalize_kernel(%arg0: i32, %arg1: i32, %arg2: memref<8x256xf32, #tpu.memory_space<vmem>>, %arg3: memref<8x1xf32, #tpu.memory_space<vmem>>, %arg4: memref<8x1xf32, #tpu.memory_space<vmem>>, %arg5: memref<8x256xf32, #tpu.memory_space<vmem>>) attributes {dimension_semantics = [#tpu.dimension_semantics<parallel>, #tpu.dimension_semantics<parallel>], iteration_bounds = array<i64: 1, 1>, scalar_prefetch = 0 : i64, scratch_operands = 0 : i64, tpu.core_type = #tpu.core_type<tc>, window_params = [{transform_indices = @transform_0, window_bounds = array<i64: 8, 256>}, {transform_indices = @transform_1, window_bounds = array<i64: 8, 1>}, {transform_indices = @transform_2, window_bounds = array<i64: 8, 1>}, {transform_indices = @transform_3, window_bounds = array<i64: 8, 256>}]} {
    %c0 = arith.constant 0 : index
    %c0_0 = arith.constant 0 : index
    %0 = vector.load %arg2[%c0, %c0_0] : memref<8x256xf32, #tpu.memory_space<vmem>>, vector<8x256xf32>
    %c0_1 = arith.constant 0 : index
    %c0_2 = arith.constant 0 : index
    %1 = vector.load %arg3[%c0_1, %c0_2] : memref<8x1xf32, #tpu.memory_space<vmem>>, vector<8x1xf32>
    %2 = vector.broadcast %1 : vector<8x1xf32> to vector<8x256xf32>
    %3 = arith.subf %0, %2 : vector<8x256xf32>
    %c0_3 = arith.constant 0 : index
    %c0_4 = arith.constant 0 : index
    %4 = vector.load %arg4[%c0_3, %c0_4] : memref<8x1xf32, #tpu.memory_space<vmem>>, vector<8x1xf32>
    %5 = vector.broadcast %4 : vector<8x1xf32> to vector<8x256xf32>
    %6 = arith.mulf %3, %5 : vector<8x256xf32>
    %c0_5 = arith.constant 0 : index
    %c0_6 = arith.constant 0 : index
    %7 = vector.load %arg5[%c0_5, %c0_6] : memref<8x256xf32, #tpu.memory_space<vmem>>, vector<8x256xf32>
    tpu.vector_store %arg5[%c0_5, %c0_6], %6 {strides = array<i32>} : memref<8x256xf32, #tpu.memory_space<vmem>>, vector<8x256xf32>,
    return
  }
  func.func @transform_0(%arg0: i32, %arg1: i32) -> (i32, i32) {
    %c0_i32 = arith.constant 0 : i32
    return %arg0, %arg1 : i32, i32
  }
  func.func @transform_1(%arg0: i32, %arg1: i32) -> (i32, i32) {
    %c0_i32 = arith.constant 0 : i32
    %c0_i32_0 = arith.constant 0 : i32
    return %arg0, %c0_i32 : i32, i32
  }
  func.func @transform_2(%arg0: i32, %arg1: i32) -> (i32, i32) {
    %c0_i32 = arith.constant 0 : i32
    %c0_i32_0 = arith.constant 0 : i32
    return %arg0, %c0_i32 : i32, i32
  }
  func.func @transform_3(%arg0: i32, %arg1: i32) -> (i32, i32) {
    %c0_i32 = arith.constant 0 : i32
    return %arg0, %arg1 : i32, i32
  }
}

</mosaic_0001>

<bundles_post_ra>
// kernel: tpu_custom_call.1
= control target key start
LH: loop header
LB: loop body
LE: loop exit
PB: predicated region body
PF: predicated region fallthrough
CT: control target
= control target key end

     0   :  { %s122_s0 = inlined_call_operand.vmem [shape: f32[6,256], index: 0, kind: input, shape index: {}]   ;;  %s123_s1 = inlined_call_operand.vmem [shape: f32[6,1], index: 1, kind: input, shape index: {}]   ;;  %s124_s2 = inlined_call_operand.vmem [shape: f32[6,1], index: 2, kind: input, shape index: {}]   ;;  %s125_s3 = inlined_call_operand.hbm [shape: f32[6,256], index: 3, kind: output, shape index: {}]  }
   0x1   :  { %v17_v0 = vld [vmem:[%s123_s1] sm:$0xff] }
   0x2   :  { %8 = vsyncpa [#allocation3], 0  ;;  %v76_v1 = vmov 0   ;;  %v25_v2 = vld [vmem:[%s124_s2] sm:$0xff]  ;;  %v16_v5 = vld [vmem:[%s122_s0 + $0x8] sm:$0xff]  ;;  %s77_s20 = smov [#allocation2]  }
   0x3   :  { %51 = vset.pattern.permute.xlu0 %v76_v1  ;;  %v15_v4 = vld [vmem:[%s122_s0] sm:$0xff]  ;;  %s41_s1 = sshll.u32 %s77_s20, 4  ;;  %s42_s1 = int_to_ptr.vmem [resolvable:$true] %s41_s1 }
   0x4   :  { %20 = vperm.xlu0 %51, %v17_v0   ;;  %s52_s2 = scalar_lea.vmem %s42_s1, 256  ;;  %p57_p1 = scmp.lt.s32.totalorder %s42_s1, %s42_s1 }
   0x5   :  { %p53_p0 = scmp.ne.s32.totalorder %s42_s1, %s52_s2  ;;  %p58_p2 = scmp.lt.s32.totalorder %s52_s2, %s52_s2 }
   0x7   :  { %p59_p3 = por %p58_p2, %p57_p1 }
   0x8   :  { %28 = vperm.xlu0 %51, %v25_v2  }
   0x9   :  { %p60_p4 = pnand %p59_p3, %p53_p0 }
  0x83   :  { %v21_v3 = vpop.permute.xlu0 %20 }
  0x84   :  { %v23_v6 = vsub.f32 %v15_v4, %v21_v3  ;;  %v24_v7 = vsub.f32 %v16_v5, %v21_v3 }
  0x87   :  { %v29_v8 = vpop.permute.xlu0 %28 }
  0x88   :  { %v31_v9 = vmul.f32 %v29_v8, %v23_v6  ;;  %v32_v10 = vmul.f32 %v29_v8, %v24_v7 }
  0x8a   :  { %33 = vst [vmem:[#allocation2] sm:$0xff] %v31_v9  ;;  %34 = vst [vmem:[#allocation2 + $0x8] sm:$0xff] %v32_v10 }
  0x8b   :  { %63 = shalt.err (!%p60_p4)
}
  0x8c   :  { %s64_s0 = scalar_lea.hbm %s125_s3, 256 }
  0x8d   :  { %p65_p5 = scmp.ne.s32.totalorder %s125_s3, %s64_s0  ;;  %p68_p6 = scmp.lt.u32.totalorder %s64_s0, %s125_s3 }
  0x8f   :  { %p70_p7 = pnand %p68_p6, %p65_p5 }
  0x91   :  { %73 = shalt.err (!%p70_p7)
}
  0x92   :  { %44 = dma.vmem_to_hbm [thread:$0]  %s42_s1, 256, %s125_s3, [#allocation3]  }
  0x93   :  { %74 = dma.done.wait [#allocation3], 256  }
  0x94   :  { %75 = vsyncadd [#allocation3], 4294967040 }
  0x95   :  { %48 = vsyncpa [#allocation3], 1 }

</bundles_post_ra>
